<compile_context>
chip_gen: v6e
topology: v6e:2x2x1
jax: 0.10.0
libtpu: 0.0.40
codegen_flags: <defaults>
</compile_context>

<pallas_src>
import functools

import jax
import jax.numpy as jnp
from jax.experimental import pallas as pl
from jax.experimental.pallas import tpu as pltpu


def autopad(k, p=None):
    """Same-padding helper, identical to the PyTorch module."""
    if p is None:
        p = k // 2 if isinstance(k, int) else [x // 2 for x in k]
    return p


def _round_up(a, b):
    return (a + b - 1) // b * b


# ---------------------------------------------------------------------------
# Pallas kernels: matmul + fused BatchNorm (eval) + SiLU epilogue
# ---------------------------------------------------------------------------
def _conv_bn_silu_kernel_single(p_ref, w_ref, scale_ref, bias_ref, o_ref,
                                *, apply_act):
    # Single reduction step: direct matmul, no accumulator round trip.
    # p_ref: (1, K, tm) bf16, w_ref: (1, C2, K) bf16 (VMEM resident),
    # scale/bias: (C2, 1) f32, o_ref: (1, C2, tm).
    y = jnp.dot(w_ref[0], p_ref[0], preferred_element_type=jnp.float32)
    y = y * scale_ref[...] + bias_ref[...]          # BatchNorm (eval mode)
    if apply_act:
        y = y * (1.0 / (1.0 + jnp.exp(-y)))         # SiLU (exp -> EUP slot)
    o_ref[0] = y.astype(o_ref.dtype)


def _conv_bn_silu_kernel_acc(p_ref, w_ref, scale_ref, bias_ref, o_ref, acc_ref,
                             *, apply_act, w_resident):
    # Multi-step reduction over the K grid axis (innermost, "arbitrary").
    # p_ref: (1, tk, tm) bf16
    # w_ref: (n_k, C2, tk) bf16 resident  OR  (1, C2, tk) bf16 streamed
    # acc_ref: (C2, tm) f32 scratch, persists across the K axis.
    kk = pl.program_id(2)

    @pl.when(kk == 0)
    def _init():
        acc_ref[...] = jnp.zeros_like(acc_ref)

    w = w_ref[kk] if w_resident else w_ref[0]
    acc_ref[...] += jnp.dot(w, p_ref[0], preferred_element_type=jnp.float32)

    @pl.when(kk == pl.num_programs(2) - 1)
    def _epilogue():
        y = acc_ref[...] * scale_ref[...] + bias_ref[...]   # BatchNorm (eval)
        if apply_act:
            y = y * (1.0 / (1.0 + jnp.exp(-y)))             # SiLU
        o_ref[0] = y.astype(o_ref.dtype)


# ---------------------------------------------------------------------------
# Wrapper helpers
# ---------------------------------------------------------------------------
def _im2col(x, k, s, p):
    """(N, C, H, W) -> patches (N, C*k*k, Ho*Wo). Pure layout, zero FLOPs."""
    N, C, H, W = x.shape
    if p:
        x = jnp.pad(x, ((0, 0), (0, 0), (p, p), (p, p)))
    Ho = (H + 2 * p - k) // s + 1
    Wo = (W + 2 * p - k) // s + 1
    cols = []
    for dy in range(k):
        for dx in range(k):
            cols.append(x[:, :, dy:dy + s * Ho:s, dx:dx + s * Wo:s])
    # K-index order = c1*k*k + dy*k + dx, matching weight.reshape(C2, C1*k*k)
    patches = jnp.stack(cols, axis=2).reshape(N, C * k * k, Ho * Wo)
    return patches, Ho, Wo


def _choose_tm(M, tk, C2, out_itemsize, multi_k, n_batch):
    """VMEM-aware spatial tile: multiple of 128, lane-dense, megacore-friendly."""
    budget = 24 << 20                       # tile budget, well under the 48 MiB limit
    # bytes of VMEM per spatial column: double-buffered bf16 patches,
    # double-buffered output, f32 accumulator (multi-K only).
    per_col = 2 * tk * 2 + 2 * C2 * out_itemsize + (C2 * 4 if multi_k else 0)
    tm_sel, mp_sel = 128, _round_up(M, 128)
    for tm in (1024, 512, 256, 128):
        if tm * per_col > budget:
            continue
        mp = _round_up(M, tm)
        waste = (mp - M) / mp
        if waste > 0.15 and tm != 128:
            continue
        if n_batch == 1 and mp // tm < 2 and M > 128:
            continue                        # keep >= 2 parallel tiles for 2-TC chips
        tm_sel, mp_sel = tm, mp
        break
    return tm_sel, mp_sel


# ---------------------------------------------------------------------------
# Public entry point: act(bn(conv(x))) with conv bias=False, BN in eval mode
# ---------------------------------------------------------------------------
def conv_forward(x, weight, gamma, beta, running_mean, running_var,
                 *, stride=1, padding=None, groups=1, act=True, eps=1e-5):
    assert groups == 1  # TODO(synk): grouped conv (g > 1) not supported here.
    C2, C1, kh, kw = weight.shape
    assert kh == kw, "only square kernels supported"
    k = kh
    p = autopad(k, padding)
    N, Cin, H, W = x.shape
    assert Cin == C1

    patches, Ho, Wo = _im2col(x, k, stride, p)          # (N, K, M)
    K = C1 * k * k
    M = Ho * Wo
    out_dtype = x.dtype
    out_isz = jnp.dtype(out_dtype).itemsize

    # Reduction tiling: drop the K grid axis entirely for small K.
    single_k = K <= 2048
    tk = K if single_k else 512
    Kp = K if single_k else _round_up(K, tk)
    n_k = Kp // tk

    tm, Mp = _choose_tm(M, tk, C2, out_isz, not single_k, N)

    # Zero-pad patches to (N, Kp, Mp): padded K contributes nothing, padded M
    # columns are sliced off after the call.  Lane-dense, unmasked stores.
    if (Kp, Mp) != (K, M):
        patches = jnp.pad(patches, ((0, 0), (0, Kp - K), (0, Mp - M)))
    patches = patches.astype(jnp.bfloat16)              # halve HBM + VMEM bytes

    # Weight packed as (n_k, C2, tk) bf16.  BN scale/bias kept as separate
    # f32 per-channel vectors (cheap epilogue, preserves f32 affine fidelity).
    w_mat = weight.reshape(C2, K)
    if Kp != K:
        w_mat = jnp.pad(w_mat, ((0, 0), (0, Kp - K)))
    w3d = w_mat.reshape(C2, n_k, tk).transpose(1, 0, 2).astype(jnp.bfloat16)

    inv = gamma / jnp.sqrt(running_var + eps)
    scale = inv.reshape(C2, 1).astype(jnp.float32)
    bias = (beta - running_mean * inv).reshape(C2, 1).astype(jnp.float32)

    apply_act = act is True

    if single_k:
        kernel = functools.partial(_conv_bn_silu_kernel_single,
                                   apply_act=apply_act)
        grid = (N, Mp // tm)
        in_specs = [
            pl.BlockSpec((1, Kp, tm), lambda n, m: (n, 0, m)),
            pl.BlockSpec((1, C2, Kp), lambda n, m: (0, 0, 0)),   # resident
            pl.BlockSpec((C2, 1), lambda n, m: (0, 0)),
            pl.BlockSpec((C2, 1), lambda n, m: (0, 0)),
        ]
        out_spec = pl.BlockSpec((1, C2, tm), lambda n, m: (n, 0, m))
        scratch = []
        dims = ("parallel", "parallel")
    else:
        w_resident = C2 * Kp * 2 <= (8 << 20)
        kernel = functools.partial(_conv_bn_silu_kernel_acc,
                                   apply_act=apply_act, w_resident=w_resident)
        grid = (N, Mp // tm, n_k)
        if w_resident:
            w_spec = pl.BlockSpec((n_k, C2, tk), lambda n, m, kk: (0, 0, 0))
        else:
            w_spec = pl.BlockSpec((1, C2, tk), lambda n, m, kk: (kk, 0, 0))
        in_specs = [
            pl.BlockSpec((1, tk, tm), lambda n, m, kk: (n, kk, m)),
            w_spec,
            pl.BlockSpec((C2, 1), lambda n, m, kk: (0, 0)),
            pl.BlockSpec((C2, 1), lambda n, m, kk: (0, 0)),
        ]
        out_spec = pl.BlockSpec((1, C2, tm), lambda n, m, kk: (n, 0, m))
        scratch = [pltpu.VMEM((C2, tm), jnp.float32)]
        dims = ("parallel", "parallel", "arbitrary")

    out_flat = pl.pallas_call(
        kernel,
        out_shape=jax.ShapeDtypeStruct((N, C2, Mp), out_dtype),
        grid_spec=pltpu.PrefetchScalarGridSpec(
            num_scalar_prefetch=0,
            grid=grid,
            in_specs=in_specs,
            out_specs=out_spec,
            scratch_shapes=scratch),
        compiler_params=pltpu.CompilerParams(
            dimension_semantics=dims,
            vmem_limit_bytes=48 * 1024 * 1024),
    )(patches, w3d, scale, bias)

    if Mp != M:
        out_flat = out_flat[:, :, :M]
    return out_flat.reshape(N, C2, Ho, Wo)


# ---------------------------------------------------------------------------
# Pure-JAX reference (matches the PyTorch forward in eval mode)
# ---------------------------------------------------------------------------
def _reference(x, weight, gamma, beta, mean, var, eps, stride, padding):
    y = jax.lax.conv_general_dilated(
        x, weight, window_strides=(stride, stride),
        padding=[(padding, padding), (padding, padding)],
        dimension_numbers=("NCHW", "OIHW", "NCHW"),
        precision=jax.lax.Precision.HIGHEST)
    inv = gamma / jnp.sqrt(var + eps)
    y = y * inv[None, :, None, None] + (beta - mean * inv)[None, :, None, None]
    return y * (1.0 / (1.0 + jnp.exp(-y)))


def _bf16_exact(a):
    # Round demo inputs to bf16-representable values so the bf16 operand cast
    # inside the kernel is lossless and the correctness check stays tight.
    return a.astype(jnp.bfloat16).astype(jnp.float32)


def _run_case(key, N, C1, C2, k, s, H, W, eps=1e-5):
    k_x, k_w, k_g, k_b, k_m, k_v = jax.random.split(key, 6)
    x = _bf16_exact(jax.random.normal(k_x, (N, C1, H, W), dtype=jnp.float32))
    w = _bf16_exact(jax.random.normal(k_w, (C2, C1, k, k), dtype=jnp.float32) * 0.05)
    gamma = jax.random.uniform(k_g, (C2,), jnp.float32, 0.5, 1.5)
    beta = jax.random.normal(k_b, (C2,), dtype=jnp.float32) * 0.1
    mean = jax.random.normal(k_m, (C2,), dtype=jnp.float32) * 0.1
    var = jax.random.uniform(k_v, (C2,), jnp.float32, 0.5, 1.5)

    out = conv_forward(x, w, gamma, beta, mean, var,
                       stride=s, padding=None, act=True, eps=eps)
    out = jax.block_until_ready(out)

    p = autopad(k, None)
    ref = _reference(x, w, gamma, beta, mean, var, eps, s, p)
    Ho = (H + 2 * p - k) // s + 1
    Wo = (W + 2 * p - k) // s + 1
    assert out.shape == (N, C2, Ho, Wo), out.shape
    assert out.dtype == x.dtype
    err = float(jnp.max(jnp.abs(out - ref)))
    assert jnp.allclose(out, ref, atol=2e-3, rtol=2e-3), err
    return err


if __name__ == "__main__":
    key = jax.random.PRNGKey(0)
    k1, k2 = jax.random.split(key)

    # Case 1: Conv(c1=4, c2=8, k=3, s=1) on (2, 4, 16, 16)
    #   -> K = 36 <= 2048: single-K fast path (no accumulator, resident weight).
    _run_case(k1, N=2, C1=4, C2=8, k=3, s=1, H=16, W=16)

    # Case 2: Conv(c1=256, c2=32, k=3, s=1) on (1, 256, 8, 8)
    #   -> K = 2304 > 2048: multi-K path with VMEM-resident packed weight,
    #      f32 accumulator scratch and padded lane-dense spatial tiles.
    _run_case(k2, N=1, C1=256, C2=32, k=3, s=1, H=8, W=8)

    print("KERNEL_OK")
</pallas_src>

<mosaic_0001>
module attributes {stable_mosaic.version = 11 : i64} {
  func.func @_conv_bn_silu_kernel_single(%arg0: i32, %arg1: i32, %arg2: memref<1x36x256xbf16, #tpu.memory_space<vmem>>, %arg3: memref<1x8x36xbf16, #tpu.memory_space<vmem>>, %arg4: memref<8x1xf32, #tpu.memory_space<vmem>>, %arg5: memref<8x1xf32, #tpu.memory_space<vmem>>, %arg6: memref<1x8x256xf32, #tpu.memory_space<vmem>>) attributes {dimension_semantics = [#tpu.dimension_semantics<parallel>, #tpu.dimension_semantics<parallel>], iteration_bounds = array<i64: 2, 1>, scalar_prefetch = 0 : i64, scratch_operands = 0 : i64, tpu.core_type = #tpu.core_type<tc>, window_params = [{transform_indices = @transform_0, window_bounds = array<i64: 1, 36, 256>}, {pipeline_mode = #tpu.pipeline_mode<synchronous>, transform_indices = @transform_1, window_bounds = array<i64: 1, 8, 36>}, {pipeline_mode = #tpu.pipeline_mode<synchronous>, transform_indices = @transform_2, window_bounds = array<i64: 8, 1>}, {pipeline_mode = #tpu.pipeline_mode<synchronous>, transform_indices = @transform_3, window_bounds = array<i64: 8, 1>}, {transform_indices = @transform_4, window_bounds = array<i64: 1, 8, 256>}]} {
    %c0 = arith.constant 0 : index
    %c0_0 = arith.constant 0 : index
    %c0_1 = arith.constant 0 : index
    %0 = vector.load %arg3[%c0, %c0_0, %c0_1] : memref<1x8x36xbf16, #tpu.memory_space<vmem>>, vector<1x8x36xbf16>
    %1 = vector.shape_cast %0 : vector<1x8x36xbf16> to vector<8x36xbf16>
    %c0_2 = arith.constant 0 : index
    %c0_3 = arith.constant 0 : index
    %c0_4 = arith.constant 0 : index
    %2 = vector.load %arg2[%c0_2, %c0_3, %c0_4] : memref<1x36x256xbf16, #tpu.memory_space<vmem>>, vector<1x36x256xbf16>
    %3 = vector.shape_cast %2 : vector<1x36x256xbf16> to vector<36x256xbf16>
    %cst = arith.constant dense<0.000000e+00> : vector<8x256xf32>
    %4 = tpu.matmul %1, %3, %cst {dimension_numbers = #tpu.dot_dimension_numbers<[1], [0], [0], [1], [0, 0, 1, 1], [], []>} : vector<8x36xbf16>, vector<36x256xbf16>, vector<8x256xf32> -> vector<8x256xf32>
    %c0_5 = arith.constant 0 : index
    %c0_6 = arith.constant 0 : index
    %5 = vector.load %arg4[%c0_5, %c0_6] : memref<8x1xf32, #tpu.memory_space<vmem>>, vector<8x1xf32>
    %6 = vector.broadcast %5 : vector<8x1xf32> to vector<8x256xf32>
    %7 = arith.mulf %4, %6 : vector<8x256xf32>
    %c0_7 = arith.constant 0 : index
    %c0_8 = arith.constant 0 : index
    %8 = vector.load %arg5[%c0_7, %c0_8] : memref<8x1xf32, #tpu.memory_space<vmem>>, vector<8x1xf32>
    %9 = vector.broadcast %8 : vector<8x1xf32> to vector<8x256xf32>
    %10 = arith.addf %7, %9 : vector<8x256xf32>
    %cst_9 = arith.constant 0.000000e+00 : f32
    %11 = vector.broadcast %cst_9 : f32 to vector<8x256xf32>
    %12 = arith.subf %11, %10 : vector<8x256xf32>
    %13 = math.exp %12 : vector<8x256xf32>
    %cst_10 = arith.constant 1.000000e+00 : f32
    %14 = vector.broadcast %cst_10 : f32 to vector<8x256xf32>
    %15 = arith.addf %14, %13 : vector<8x256xf32>
    %cst_11 = arith.constant 1.000000e+00 : f32
    %16 = vector.broadcast %cst_11 : f32 to vector<8x256xf32>
    %17 = arith.divf %16, %15 : vector<8x256xf32>
    %18 = arith.mulf %10, %17 : vector<8x256xf32>
    %c0_12 = arith.constant 0 : index
    %c0_13 = arith.constant 0 : index
    %c0_14 = arith.constant 0 : index
    %19 = vector.load %arg6[%c0_12, %c0_13, %c0_14] : memref<1x8x256xf32, #tpu.memory_space<vmem>>, vector<1x8x256xf32>
    %20 = vector.shape_cast %19 : vector<1x8x256xf32> to vector<8x256xf32>
    %21 = vector.shape_cast %18 : vector<8x256xf32> to vector<1x8x256xf32>
    tpu.vector_store %arg6[%c0_12, %c0_13, %c0_14], %21 {strides = array<i32>} : memref<1x8x256xf32, #tpu.memory_space<vmem>>, vector<1x8x256xf32>,
    return
  }
  func.func @transform_0(%arg0: i32, %arg1: i32) -> (i32, i32, i32) {
    %c0_i32 = arith.constant 0 : i32
    %c0_i32_0 = arith.constant 0 : i32
    return %arg0, %c0_i32, %arg1 : i32, i32, i32
  }
  func.func @transform_1(%arg0: i32, %arg1: i32) -> (i32, i32, i32) {
    %c0_i32 = arith.constant 0 : i32
    %c0_i32_0 = arith.constant 0 : i32
    %c0_i32_1 = arith.constant 0 : i32
    %c0_i32_2 = arith.constant 0 : i32
    return %c0_i32, %c0_i32_0, %c0_i32_1 : i32, i32, i32
  }
  func.func @transform_2(%arg0: i32, %arg1: i32) -> (i32, i32) {
    %c0_i32 = arith.constant 0 : i32
    %c0_i32_0 = arith.constant 0 : i32
    %c0_i32_1 = arith.constant 0 : i32
    return %c0_i32, %c0_i32_0 : i32, i32
  }
  func.func @transform_3(%arg0: i32, %arg1: i32) -> (i32, i32) {
    %c0_i32 = arith.constant 0 : i32
    %c0_i32_0 = arith.constant 0 : i32
    %c0_i32_1 = arith.constant 0 : i32
    return %c0_i32, %c0_i32_0 : i32, i32
  }
  func.func @transform_4(%arg0: i32, %arg1: i32) -> (i32, i32, i32) {
    %c0_i32 = arith.constant 0 : i32
    %c0_i32_0 = arith.constant 0 : i32
    return %arg0, %c0_i32, %arg1 : i32, i32, i32
  }
}

</mosaic_0001>

<bundles_post_ra>
// kernel: tpu_custom_call.1
= control target key start
LH: loop header
LB: loop body
LE: loop exit
PB: predicated region body
PF: predicated region fallthrough
CT: control target
= control target key end

     0   :  { %9 = vsyncpa [#allocation3], 0  ;;  %s744_s0 = inlined_call_operand.vmem [shape: bf16[2,36,256], index: 0, kind: input, shape index: {}]   ;;  %s745_s1 = inlined_call_operand.vmem [shape: bf16[1,8,36], index: 1, kind: input, shape index: {}]   ;;  %s746_s2 = inlined_call_operand.vmem [shape: f32[8,1], index: 2, kind: input, shape index: {}]   ;;  %s747_s3 = inlined_call_operand.vmem [shape: f32[8,1], index: 3, kind: input, shape index: {}]   ;;  %s748_s4 = inlined_call_operand.hbm [shape: f32[2,8,256], index: 4, kind: output, shape index: {}]  }
   0x1   :  { %11 = vsyncpa [#allocation3 + $0x1], 0  ;;  %s636_s15 = smov 0   ;;  %s638_s16 = smov 0  }
   0x2   :  { %s640_s17 = smov 0   ;;  %s642_s18 = smov 0  }
   0x3   :  { %s644_s19 = smov 0   ;;  %s646_s20 = smov 0  }
   0x4 LB: > { %s436_s21 = sadd.s32 4294967295, %s607_s20   ;;  %s437_s22 = sadd.s32 4294967294, %s607_s20   ;;  %s607_s20 = sphi %s646_s20, %s17_s20   ;;  %s603_s19 = sphi %s644_s19, %s755_s19   ;;  %s599_s18 = sphi %s642_s18, %s754_s18   ;;  %s595_s17 = sphi %s640_s17, %s753_s17   ;;  %s591_s16 = sphi %s638_s16, %s752_s16   ;;  %s587_s15 = sphi %s636_s15, %s751_s15  }
   0x5   : > { %s29_s23 = sadd.s32 1, %s603_s19  ;;  %s129_s24 = sadd.s32 1, %s595_s17 }
   0x6   : > { %p31_p0 = scmp.ge.s32.totalorder %s29_s23, 2  ;;  %p139_p1 = scmp.ne.s32.totalorder %s595_s17, %s591_s16 }
   0x7   : > { %p140_p2 = scmp.eq.s32.totalorder %s436_s21, 1  ;;  %p145_p3 = scmp.ne.s32.totalorder %s591_s16, %s587_s15 }
   0x8   : > { %s757_s23 = smov (%p31_p0, %s29_s23), 0  ;;  %p146_p5 = scmp.eq.s32.totalorder %s437_s22, 1 }
   0x9   : > { %p676_p4 = por %p140_p2, %p139_p1  ;;  %s124_s26 = ssub.s32 %s603_s19, %s757_s23 }
   0xa   : > { %p440_p6 = scmp.ge.s32.totalorder %s607_s20, 1  ;;  %p127_p7 = scmp.eq.s32.totalorder %s124_s26, 0 }
   0xb   : > { %p683_p8 = por %p146_p5, %p145_p3  ;;  %p186_p9 = scmp.lt.s32.totalorder %s607_s20, 3 }
   0xc   : > { %s689_s28 = scalar_select %p127_p7, %s595_s17, %s129_s24  }
   0xd   : > { %p187_p10 = pnand %p440_p6, %p186_p9 }
   0xe   : > { %p217_p11 = scmp.lt.s32.totalorder (!%p187_p10), %s599_s18, 1  ;;  %s213_s14 = sand.u32 (!%p187_p10), 1, %s591_s16  }
   0xf   : > { %190 = sbr.rel (%p187_p10) target bundleno = 288 (0x120), region = 36  ;;  %s441_s21 = sshll.u32 (!%p187_p10), %s213_s14, 4 }
  0x10   : > { %s456_s22 = sshll.u32 (!%p187_p10), %s599_s18, 8  ;;  %s215_s24 = scalar_lea.vmem (!%p187_p10), [#allocation2], %s441_s21 }
  0x11   : > { %s360_s26 = sshll.u32 (!%p187_p10), %s215_s24, 4  ;;  %s344_s6 = scalar_lea.sflag (!%p187_p10), [#allocation3], %s213_s14  ;;  %s361_s26 = int_to_ptr.vmem [resolvable:$true] %s360_s26 }
  0x12   : > { %s531_s7 = scalar_lea.vmem (!%p187_p10), %s361_s26, 256 }
  0x13   : > { %p532_p12 = scmp.ne.s32.totalorder (!%p187_p10), %s361_s26, %s531_s7 }
  0x14   : > { %v609_v0 = vmov 0   ;;  %v311_v1 = vld [vmem:[%s746_s2] sm:$0xff]  ;;  %s218_s5 = scalar_select %p217_p11, %s599_s18, 1  ;;  %vm263_vm0 = vcmask 1041408   ;;  %vm259_vm1 = vcmask 293888  }
  0x15   : > { %302 = vmatprep.mubr.bf16.mxu0 %v609_v0  ;;  %514 = vset.pattern.permute.xlu0 %v609_v0  ;;  %v319_v2 = vld [vmem:[%s747_s3] sm:$0xff]  ;;  %p533_p13 = pnand %p532_p12, %p676_p4 }
  0x16   : > { %314 = vperm.xlu0 %514, %v311_v1   ;;  %s457_s8 = smul.u32 40, %s218_s5  ;;  %v228_v11 = vld [vmem:[%s745_s1] sm:$0xf]  ;;  %s358_s5 = scalar_lea.hbm %s748_s4, %s456_s22 }
  0x17   : > { %p534_p0 = pneg %p533_p13 }
  0x18   : > { %s224_s11 = scalar_lea.vmem %s744_s0, %s457_s8  ;;  %s610_s8 = smov [#allocation2]  }
  0x19   : > { %v233_v3 = vld [vmem:[%s224_s11 + $0x20] sm:$0x33]  ;;  %v517_v6 = vld [vmem:[%s224_s11 + $0x14] ss:$8 sps:$4 sm:$0xff]   ;;  %v519_v8 = vld [vmem:[%s224_s11 + $0x10] ss:$8 sps:$4 sm:$0xff]  }
  0x1a   : > { %322 = vperm.xlu0 %514, %v319_v2   ;;  %v448_v4 = vcombine.high %v233_v3, %v233_v3  ;;  %v447_v5 = vcombine.low %v233_v3, %v233_v3  ;;  %v520_v9 = vld [vmem:[%s224_s11 + $0x4] ss:$8 sps:$4 sm:$0xff]   ;;  %v522_v10 = vld [vmem:[%s224_s11] ss:$8 sps:$4 sm:$0xff]   ;;  %s535_s18 = sshll.u32 %s610_s8, 4  ;;  %s536_s18 = int_to_ptr.vmem [resolvable:$false] %s535_s18 }
  0x1b   : > { %s537_s9 = scalar_lea.vmem %s536_s18, 512  ;;  %p538_p1 = scmp.lt.s32.totalorder %s361_s26, %s536_s18 }
  0x1c   : > { %449 = vmatprep.subr.msk.bf16.mxu0 %vm263_vm0, %v448_v4  ;;  %v265_v7 = vsel %vm263_vm0, %v447_v5, 0  ;;  %p539_p2 = scmp.lt.s32.totalorder %s537_s9, %s531_s7 }
  0x1d   : > { %281 = vmatpush1.bf16.msra.mxu0 %v265_v7 }
  0x1e   : > { %282 = vmatprep.subr.bf16.mxu0 %v517_v6  ;;  %p540_p3 = por %p539_p2, %p538_p1 }
  0x20   : > { %p541_p5 = pnand %p540_p3, %p534_p0 }
  0x21   : > { %283 = vmatpush1.bf16.msra.mxu0 %v519_v8 }
  0x22   : > { %284 = vmatprep.subr.bf16.mxu0 %v520_v9 }
  0x25   : > { %285 = vmatpush1.bf16.msra.mxu0 %v522_v10 }
  0x28   : > { %450 = vmatmul.mubr.msk.bf16.vlgmr.msra.gmra.mxu0 %vm259_vm1, %v228_v11 }
  0x91   : > { %v315_v12 = vpop.permute.xlu0 %314 }
  0x95   : > { %v323_v15 = vpop.permute.xlu0 %322 }
  0xe8   : > { %v304_v13 = vpop.f32.mrf.mxu0 }
  0xe9   : > { %v317_v14 = vmul.f32 %v315_v12, %v304_v13 }
  0xea   : > { %v306_v16 = vpop.f32.mrf.mxu0 }
  0xeb   : > { %v325_v17 = vadd.f32 %v323_v15, %v317_v14  ;;  %v318_v18 = vmul.f32 %v315_v12, %v306_v16 }
  0xec   : > { %v308_v19 = vpop.f32.mrf.mxu0 }
  0xed   : > { %v327_v20 = vsub.f32 0.0, %v325_v17  ;;  %v326_v21 = vadd.f32 %v323_v15, %v318_v18 }
  0xee   : > { %v309_v22 = vpop.f32.mrf.mxu0 }
  0xef   : > { %v329_v23 = vmul.f32 1.442695, %v327_v20  ;;  %v328_v24 = vsub.f32 0.0, %v326_v21 }
  0xf1   : > { %523 = vpow2.f32 %v329_v23  ;;  %v331_v25 = vmul.f32 1.442695, %v328_v24 }
  0xf3   : > { %525 = vpow2.f32 %v331_v25 }
  0xfe   : > { %v524_v26 = vpop.eup %523 }
  0xff   : > { %v333_v27 = vadd.f32 1.0, %v524_v26 }
 0x100   : > { %v526_v28 = vpop.eup %525 }
 0x101   : > { %527 = vrcp.f32 %v333_v27  ;;  %v334_v29 = vadd.f32 1.0, %v526_v28 }
 0x103   : > { %529 = vrcp.f32 %v334_v29 }
 0x10e   : > { %v528_v30 = vpop.eup %527 }
 0x10f   : > { %v339_v31 = vmul.f32 %v528_v30, %v325_v17 }
 0x110   : > { %v530_v32 = vpop.eup %529 }
 0x111   : > { %v340_v33 = vmul.f32 %v530_v32, %v326_v21  ;;  %341 = vst [vmem:[%s215_s24] sm:$0xff] %v339_v31 }
 0x113   : > { %342 = vst [vmem:[%s215_s24 + $0x8] sm:$0xff] %v340_v33 }
 0x114   : > { %544 = shalt.err (!%p541_p5)
}
 0x115   : > { %s545_s10 = scalar_lea.hbm %s358_s5, 256  ;;  %s549_s13 = scalar_lea.hbm %s748_s4, 512 }
 0x116   : > { %p546_p6 = scmp.ne.s32.totalorder %s358_s5, %s545_s10  ;;  %p550_p10 = scmp.lt.s32.totalorder %s358_s5, %s748_s4 }
 0x117   : > { %p551_p11 = scmp.lt.s32.totalorder %s549_s13, %s545_s10 }
 0x118   : > { %p547_p7 = pnand %p546_p6, %p676_p4 }
 0x119   : > { %p552_p12 = por %p551_p11, %p550_p10 }
 0x11a   : > { %p548_p9 = pneg %p547_p7 }
 0x11c   : > { %p553_p13 = pnand %p552_p12, %p548_p9 }
 0x11e   : > { %556 = shalt.err (!%p553_p13)
}
 0x11f   : > { %458 = dma.vmem_to_hbm [thread:$0]  (%p676_p4), %s361_s26, 256, %s358_s5, %s344_s6  }
 0x120 PF: > { %p464_p0 = scmp.ge.s32.totalorder %s607_s20, 2  ;;  %s372_s22 = sand.u32 1, %s587_s15  }
 0x121   : > { %s373_s24 = scalar_lea.sflag [#allocation3], %s372_s22 }
 0x122   : > { %p461_p1 = pnand %p464_p0, %p683_p8 }
 0x124   : > { %p462_p2 = pneg %p461_p1 }
 0x126   : > { %582 = dma.done.wait (%p462_p2), %s373_s24, 256  }
 0x127   : > { %584 = vsyncadd (%p462_p2), %s373_s24, 4294967040  ;;  %s17_s20 = sadd.s32 1, %s607_s20   ;;  %s751_s15 = smov %s591_s16 }
 0x128   : > { %p14_p3 = scmp.ge.s32.totalorder %s17_s20, 4   ;;  %s752_s16 = smov %s595_s17 }
 0x129   : > { %s753_s17 = smov %s689_s28  ;;  %s754_s18 = smov %s603_s19 }
 0x12a   : > { %s755_s19 = smov %s757_s23  ;;  %16 = sbr.rel (!%p14_p3) target bundleno = 4 (0x4), region = 71 }
 0x12f   :  { %378 = vsyncpa [#allocation3], 1 }
 0x130   :  { %380 = vsyncpa [#allocation3 + $0x1], 1 }

</bundles_post_ra>
